<compile_context>
chip_gen: v6e
topology: v6e:2x2x1
jax: 0.10.0
libtpu: 0.0.40
codegen_flags: <defaults>
</compile_context>

<pallas_src>
import jax
import jax.numpy as jnp
from jax import lax
from jax.experimental import pallas as pl
from jax.experimental.pallas import tpu as pltpu


_LANES = 128


def _round_up(x, m):
    return (x + m - 1) // m * m


def _num_parallel_splits():
    """2 on v7x (two TensorCores per chip), 1 on single-TC chips."""
    try:
        kind = jax.devices()[0].device_kind.lower()
    except Exception:
        return 1
    return 2 if ("v7" in kind or "7x" in kind) else 1


def _max_tile_rows(splits):
    # 8 MiB f32 blocks on v7x (amortizes ~0.35us/step against 3.2 TB/s),
    # 4 MiB elsewhere; 2 inputs double-buffered stay well inside VMEM.
    return 16384 if splits == 2 else 8192


def _as_lane_rows(x):
    """View (N, 2) class scores as a lane-dense (rows, 128) interleaved slab.

    Free (no copy) when 2N is a multiple of 128; otherwise pads the flat
    buffer by < 128 elements (the padded tail is masked in-kernel).
    """
    n = x.shape[0]
    assert x.shape[1] == 2, "BinaryLoss expects two-class scores"
    if n == 0:
        return jnp.zeros((1, _LANES), x.dtype), 0
    flat = x.reshape(-1)                       # contiguous (N, 2) -> (2N,), free
    elems = 2 * n
    padded = _round_up(elems, _LANES)
    if padded != elems:
        flat = jnp.pad(flat, (0, padded - elems))
    return flat.reshape(padded // _LANES, _LANES), n


def _make_kernel(tile_rows, bps_pos, bps_neg, blocks_pos, blocks_neg,
                 n_pos, n_neg):
    full_rows_pos, rem_pos = divmod(2 * n_pos, _LANES)
    full_rows_neg, rem_neg = divmod(2 * n_neg, _LANES)

    def accumulate(x_ref, out_ref, is_pos, base_row, work, full_rows, rem):
        # Is every row of this block fully inside the valid element range?
        interior = base_row + tile_rows <= full_rows

        def body(boundary):
            x = x_ref[...].astype(jnp.float32)           # (tile_rows, 128)
            # shift 127 == -1 (mod 128): partner[i] = x[i+1] within each row,
            # i.e. each sample's class-1 score lands on its class-0 (even) lane.
            partner = pltpu.roll(x, _LANES - 1, 1)
            m = x - partner if is_pos else partner - x   # even lanes: +-(x0-x1)
            # Overflow-safe softplus (see file header re. the log1p tail).
            sp = jnp.maximum(m, 0.0) + jnp.log(1.0 + jnp.exp(-jnp.abs(m)))

            lane = lax.broadcasted_iota(jnp.int32, sp.shape, 1)
            keep = (lane & 1) == 0                       # samples on even lanes
            if boundary:                                 # ragged last block only
                row = base_row + lax.broadcasted_iota(jnp.int32, sp.shape, 0)
                keep = keep & ((row < full_rows)
                               | ((row == full_rows) & (lane < rem)))
            out_ref[...] += jnp.sum(jnp.where(keep, sp, 0.0),
                                    axis=0, keepdims=True)[None]

        @pl.when(work & interior)
        def _():
            body(False)

        @pl.when(work & jnp.logical_not(interior))
        def _():
            body(True)

    def kernel(pos_ref, neg_ref, out_ref):
        s = pl.program_id(0)      # TensorCore split axis (parallel)
        i = pl.program_id(1)      # streaming reduction axis (arbitrary)

        @pl.when(i == 0)
        def _():
            out_ref[...] = jnp.zeros_like(out_ref)

        # --- phase 1: positive scores (first bps_pos inner steps) ---
        b_pos = s * bps_pos + i
        work_pos = (i < bps_pos) & (b_pos < blocks_pos)
        accumulate(pos_ref, out_ref, True, b_pos * tile_rows, work_pos,
                   full_rows_pos, rem_pos)

        # --- phase 2: negative scores (remaining inner steps) ---
        b_neg = s * bps_neg + (i - bps_pos)
        work_neg = (i >= bps_pos) & (b_neg < blocks_neg)
        accumulate(neg_ref, out_ref, False, b_neg * tile_rows, work_neg,
                   full_rows_neg, rem_neg)

    return kernel


def binary_loss(pos_score, neg_score):
    """Pallas implementation of BinaryLoss.forward. Returns a scalar f32."""
    pos2d, n_pos = _as_lane_rows(pos_score)
    neg2d, n_neg = _as_lane_rows(neg_score)

    rows_pos, rows_neg = pos2d.shape[0], neg2d.shape[0]
    splits = _num_parallel_splits()
    tile_rows = min(_max_tile_rows(splits),
                    _round_up(max(rows_pos, rows_neg), 8))
    blocks_pos = pl.cdiv(rows_pos, tile_rows)
    blocks_neg = pl.cdiv(rows_neg, tile_rows)
    if blocks_pos + blocks_neg < 2 * splits:      # not enough work to split
        splits = 1
    bps_pos = pl.cdiv(blocks_pos, splits)         # blocks per split (rounded up)
    bps_neg = pl.cdiv(blocks_neg, splits)
    inner = bps_pos + bps_neg

    # Clamped index maps: outside a tensor's phase its block index stays
    # constant, so the pipeline keeps that buffer resident (no re-DMA).
    def pos_map(s, i):
        j = jnp.minimum(i, bps_pos - 1)
        return (jnp.minimum(s * bps_pos + j, blocks_pos - 1), 0)

    def neg_map(s, i):
        j = jnp.maximum(i - bps_pos, 0)
        return (jnp.minimum(s * bps_neg + j, blocks_neg - 1), 0)

    itemsize = max(pos2d.dtype.itemsize, neg2d.dtype.itemsize)
    block_bytes = tile_rows * _LANES * itemsize
    vmem_limit = int(max(32 << 20, 4 * block_bytes + (8 << 20)))

    kernel = _make_kernel(tile_rows, bps_pos, bps_neg, blocks_pos, blocks_neg,
                          n_pos, n_neg)
    partials = pl.pallas_call(
        kernel,
        out_shape=jax.ShapeDtypeStruct((splits, 1, _LANES), jnp.float32),
        grid_spec=pltpu.PrefetchScalarGridSpec(
            num_scalar_prefetch=0,
            grid=(splits, inner),
            in_specs=[
                pl.BlockSpec((tile_rows, _LANES), pos_map),
                pl.BlockSpec((tile_rows, _LANES), neg_map),
            ],
            out_specs=pl.BlockSpec((1, 1, _LANES), lambda s, i: (s, 0, 0)),
        ),
        compiler_params=pltpu.CompilerParams(
            dimension_semantics=("parallel", "arbitrary"),
            vmem_limit_bytes=vmem_limit),
    )(pos2d, neg2d)

    # Single tiny final reduce of the per-split / per-lane partial sums.
    return jnp.sum(partials)


def _reference(pos_score, neg_score):
    pos_loss = -jax.nn.log_softmax(pos_score.astype(jnp.float32), axis=1)[:, 1]
    neg_loss = -jax.nn.log_softmax(neg_score.astype(jnp.float32), axis=1)[:, 0]
    return pos_loss.sum() + neg_loss.sum()


if __name__ == "__main__":
    key = jax.random.PRNGKey(0)
    k1, k2 = jax.random.split(key)
    # Small (batch, 2) class-score inputs; different batch sizes exercise the
    # ragged / boundary-mask path.
    pos_score = jax.random.normal(k1, (37, 2), dtype=jnp.float32)
    neg_score = jax.random.normal(k2, (52, 2), dtype=jnp.float32)

    loss = jax.jit(binary_loss)(pos_score, neg_score)
    jax.block_until_ready(loss)

    ref = _reference(pos_score, neg_score)
    assert jnp.allclose(loss, ref, rtol=1e-5, atol=1e-5), (loss, ref)
    print("KERNEL_OK")
</pallas_src>

<mosaic_0001>
module attributes {stable_mosaic.version = 11 : i64} {
  func.func @kernel(%arg0: i32, %arg1: i32, %arg2: memref<8x128xf32, #tpu.memory_space<vmem>>, %arg3: memref<8x128xf32, #tpu.memory_space<vmem>>, %arg4: memref<1x1x128xf32, #tpu.memory_space<vmem>>) attributes {dimension_semantics = [#tpu.dimension_semantics<parallel>, #tpu.dimension_semantics<arbitrary>], iteration_bounds = array<i64: 1, 2>, scalar_prefetch = 0 : i64, scratch_operands = 0 : i64, tpu.core_type = #tpu.core_type<tc>, window_params = [{transform_indices = @transform_0, window_bounds = array<i64: 8, 128>}, {transform_indices = @transform_1, window_bounds = array<i64: 8, 128>}, {transform_indices = @transform_2, window_bounds = array<i64: 1, 1, 128>}]} {
    %c0_i32 = arith.constant 0 : i32
    %0 = arith.cmpi eq, %arg1, %c0_i32 : i32
    %1 = arith.extui %0 : i1 to i32
    %c0_i32_0 = arith.constant 0 : i32
    %2 = arith.cmpi ne, %1, %c0_i32_0 : i32
    scf.if %2 {
      %cst = arith.constant 0.000000e+00 : f32
      %34 = vector.broadcast %cst : f32 to vector<1x1x128xf32>
      %c0 = arith.constant 0 : index
      %c0_17 = arith.constant 0 : index
      %c0_18 = arith.constant 0 : index
      %35 = vector.load %arg4[%c0, %c0_17, %c0_18] : memref<1x1x128xf32, #tpu.memory_space<vmem>>, vector<1x1x128xf32>
      tpu.vector_store %arg4[%c0, %c0_17, %c0_18], %34 {strides = array<i32>} : memref<1x1x128xf32, #tpu.memory_space<vmem>>, vector<1x1x128xf32>,
    } else {
    }
    %c1_i32 = arith.constant 1 : i32
    %3 = arith.muli %arg0, %c1_i32 : i32
    %4 = arith.addi %3, %arg1 : i32
    %c1_i32_1 = arith.constant 1 : i32
    %5 = arith.cmpi slt, %arg1, %c1_i32_1 : i32
    %c1_i32_2 = arith.constant 1 : i32
    %6 = arith.cmpi slt, %4, %c1_i32_2 : i32
    %7 = arith.andi %5, %6 : i1
    %c8_i32 = arith.constant 8 : i32
    %8 = arith.muli %4, %c8_i32 : i32
    %c8_i32_3 = arith.constant 8 : i32
    %9 = arith.addi %8, %c8_i32_3 : i32
    %c0_i32_4 = arith.constant 0 : i32
    %10 = arith.cmpi sle, %9, %c0_i32_4 : i32
    %11 = arith.andi %7, %10 : i1
    %12 = arith.extui %11 : i1 to i32
    %c0_i32_5 = arith.constant 0 : i32
    %13 = arith.cmpi ne, %12, %c0_i32_5 : i32
    scf.if %13 {
      %c0 = arith.constant 0 : index
      %c0_17 = arith.constant 0 : index
      %34 = vector.load %arg2[%c0, %c0_17] : memref<8x128xf32, #tpu.memory_space<vmem>>, vector<8x128xf32>
      %c127_i32 = arith.constant 127 : i32
      %35 = tpu.dynamic_rotate %34 by %c127_i32 dim 1 : vector<8x128xf32>, i32 -> vector<8x128xf32>
      %36 = arith.subf %34, %35 : vector<8x128xf32>
      %cst = arith.constant 0.000000e+00 : f32
      %37 = vector.broadcast %cst : f32 to vector<8x128xf32>
      %38 = arith.maximumf %36, %37 : vector<8x128xf32>
      %39 = math.absf %36 : vector<8x128xf32>
      %cst_18 = arith.constant 0.000000e+00 : f32
      %40 = vector.broadcast %cst_18 : f32 to vector<8x128xf32>
      %41 = arith.subf %40, %39 : vector<8x128xf32>
      %42 = math.exp %41 : vector<8x128xf32>
      %cst_19 = arith.constant 1.000000e+00 : f32
      %43 = vector.broadcast %cst_19 : f32 to vector<8x128xf32>
      %44 = arith.addf %43, %42 : vector<8x128xf32>
      %45 = math.log %44 : vector<8x128xf32>
      %46 = arith.addf %38, %45 : vector<8x128xf32>
      %47 = tpu.iota {dimensions = array<i32: 1>} : vector<8x128xi32>
      %c1_i32_20 = arith.constant 1 : i32
      %48 = vector.broadcast %c1_i32_20 : i32 to vector<8x128xi32>
      %49 = arith.andi %47, %48 : vector<8x128xi32>
      %c0_i32_21 = arith.constant 0 : i32
      %50 = vector.broadcast %c0_i32_21 : i32 to vector<8x128xi32>
      %51 = arith.cmpi eq, %49, %50 : vector<8x128xi32>
      %c0_22 = arith.constant 0 : index
      %c0_23 = arith.constant 0 : index
      %c0_24 = arith.constant 0 : index
      %52 = vector.load %arg4[%c0_22, %c0_23, %c0_24] : memref<1x1x128xf32, #tpu.memory_space<vmem>>, vector<1x1x128xf32>
      %cst_25 = arith.constant 0.000000e+00 : f32
      %53 = vector.broadcast %cst_25 : f32 to vector<8x128xf32>
      %54 = arith.select %51, %46, %53 : vector<8x128xi1>, vector<8x128xf32>
      %cst_26 = arith.constant dense<0.000000e+00> : vector<128xf32>
      %55 = vector.multi_reduction <add>, %54, %cst_26 [0] : vector<8x128xf32> to vector<128xf32>
      %56 = vector.shape_cast %55 : vector<128xf32> to vector<1x128xf32>
      %57 = vector.shape_cast %56 : vector<1x128xf32> to vector<1x1x128xf32>
      %58 = arith.addf %52, %57 : vector<1x1x128xf32>
      %c0_27 = arith.constant 0 : index
      %c0_28 = arith.constant 0 : index
      %c0_29 = arith.constant 0 : index
      %59 = vector.load %arg4[%c0_27, %c0_28, %c0_29] : memref<1x1x128xf32, #tpu.memory_space<vmem>>, vector<1x1x128xf32>
      tpu.vector_store %arg4[%c0_27, %c0_28, %c0_29], %58 {strides = array<i32>} : memref<1x1x128xf32, #tpu.memory_space<vmem>>, vector<1x1x128xf32>,
    } else {
    }
    %true = arith.constant true
    %14 = arith.xori %10, %true : i1
    %15 = arith.andi %7, %14 : i1
    %16 = arith.extui %15 : i1 to i32
    %c0_i32_6 = arith.constant 0 : i32
    %17 = arith.cmpi ne, %16, %c0_i32_6 : i32
    scf.if %17 {
      %c0 = arith.constant 0 : index
      %c0_17 = arith.constant 0 : index
      %34 = vector.load %arg2[%c0, %c0_17] : memref<8x128xf32, #tpu.memory_space<vmem>>, vector<8x128xf32>
      %c127_i32 = arith.constant 127 : i32
      %35 = tpu.dynamic_rotate %34 by %c127_i32 dim 1 : vector<8x128xf32>, i32 -> vector<8x128xf32>
      %36 = arith.subf %34, %35 : vector<8x128xf32>
      %cst = arith.constant 0.000000e+00 : f32
      %37 = vector.broadcast %cst : f32 to vector<8x128xf32>
      %38 = arith.maximumf %36, %37 : vector<8x128xf32>
      %39 = math.absf %36 : vector<8x128xf32>
      %cst_18 = arith.constant 0.000000e+00 : f32
      %40 = vector.broadcast %cst_18 : f32 to vector<8x128xf32>
      %41 = arith.subf %40, %39 : vector<8x128xf32>
      %42 = math.exp %41 : vector<8x128xf32>
      %cst_19 = arith.constant 1.000000e+00 : f32
      %43 = vector.broadcast %cst_19 : f32 to vector<8x128xf32>
      %44 = arith.addf %43, %42 : vector<8x128xf32>
      %45 = math.log %44 : vector<8x128xf32>
      %46 = arith.addf %38, %45 : vector<8x128xf32>
      %47 = tpu.iota {dimensions = array<i32: 1>} : vector<8x128xi32>
      %c1_i32_20 = arith.constant 1 : i32
      %48 = vector.broadcast %c1_i32_20 : i32 to vector<8x128xi32>
      %49 = arith.andi %47, %48 : vector<8x128xi32>
      %c0_i32_21 = arith.constant 0 : i32
      %50 = vector.broadcast %c0_i32_21 : i32 to vector<8x128xi32>
      %51 = arith.cmpi eq, %49, %50 : vector<8x128xi32>
      %52 = tpu.iota {dimensions = array<i32: 0>} : vector<8x128xi32>
      %53 = vector.broadcast %8 : i32 to vector<8x128xi32>
      %54 = arith.addi %53, %52 : vector<8x128xi32>
      %c0_i32_22 = arith.constant 0 : i32
      %55 = vector.broadcast %c0_i32_22 : i32 to vector<8x128xi32>
      %56 = arith.cmpi slt, %54, %55 : vector<8x128xi32>
      %c0_i32_23 = arith.constant 0 : i32
      %57 = vector.broadcast %c0_i32_23 : i32 to vector<8x128xi32>
      %58 = arith.cmpi eq, %54, %57 : vector<8x128xi32>
      %c74_i32 = arith.constant 74 : i32
      %59 = vector.broadcast %c74_i32 : i32 to vector<8x128xi32>
      %60 = arith.cmpi slt, %47, %59 : vector<8x128xi32>
      %61 = arith.andi %58, %60 : vector<8x128xi1>
      %62 = arith.ori %56, %61 : vector<8x128xi1>
      %63 = arith.andi %51, %62 : vector<8x128xi1>
      %c0_24 = arith.constant 0 : index
      %c0_25 = arith.constant 0 : index
      %c0_26 = arith.constant 0 : index
      %64 = vector.load %arg4[%c0_24, %c0_25, %c0_26] : memref<1x1x128xf32, #tpu.memory_space<vmem>>, vector<1x1x128xf32>
      %cst_27 = arith.constant 0.000000e+00 : f32
      %65 = vector.broadcast %cst_27 : f32 to vector<8x128xf32>
      %66 = arith.select %63, %46, %65 : vector<8x128xi1>, vector<8x128xf32>
      %cst_28 = arith.constant dense<0.000000e+00> : vector<128xf32>
      %67 = vector.multi_reduction <add>, %66, %cst_28 [0] : vector<8x128xf32> to vector<128xf32>
      %68 = vector.shape_cast %67 : vector<128xf32> to vector<1x128xf32>
      %69 = vector.shape_cast %68 : vector<1x128xf32> to vector<1x1x128xf32>
      %70 = arith.addf %64, %69 : vector<1x1x128xf32>
      %c0_29 = arith.constant 0 : index
      %c0_30 = arith.constant 0 : index
      %c0_31 = arith.constant 0 : index
      %71 = vector.load %arg4[%c0_29, %c0_30, %c0_31] : memref<1x1x128xf32, #tpu.memory_space<vmem>>, vector<1x1x128xf32>
      tpu.vector_store %arg4[%c0_29, %c0_30, %c0_31], %70 {strides = array<i32>} : memref<1x1x128xf32, #tpu.memory_space<vmem>>, vector<1x1x128xf32>,
    } else {
    }
    %c1_i32_7 = arith.constant 1 : i32
    %18 = arith.muli %arg0, %c1_i32_7 : i32
    %c1_i32_8 = arith.constant 1 : i32
    %19 = arith.subi %arg1, %c1_i32_8 : i32
    %20 = arith.addi %18, %19 : i32
    %c1_i32_9 = arith.constant 1 : i32
    %21 = arith.cmpi sge, %arg1, %c1_i32_9 : i32
    %c1_i32_10 = arith.constant 1 : i32
    %22 = arith.cmpi slt, %20, %c1_i32_10 : i32
    %23 = arith.andi %21, %22 : i1
    %c8_i32_11 = arith.constant 8 : i32
    %24 = arith.muli %20, %c8_i32_11 : i32
    %c8_i32_12 = arith.constant 8 : i32
    %25 = arith.addi %24, %c8_i32_12 : i32
    %c0_i32_13 = arith.constant 0 : i32
    %26 = arith.cmpi sle, %25, %c0_i32_13 : i32
    %27 = arith.andi %23, %26 : i1
    %28 = arith.extui %27 : i1 to i32
    %c0_i32_14 = arith.constant 0 : i32
    %29 = arith.cmpi ne, %28, %c0_i32_14 : i32
    scf.if %29 {
      %c0 = arith.constant 0 : index
      %c0_17 = arith.constant 0 : index
      %34 = vector.load %arg3[%c0, %c0_17] : memref<8x128xf32, #tpu.memory_space<vmem>>, vector<8x128xf32>
      %c127_i32 = arith.constant 127 : i32
      %35 = tpu.dynamic_rotate %34 by %c127_i32 dim 1 : vector<8x128xf32>, i32 -> vector<8x128xf32>
      %36 = arith.subf %35, %34 : vector<8x128xf32>
      %cst = arith.constant 0.000000e+00 : f32
      %37 = vector.broadcast %cst : f32 to vector<8x128xf32>
      %38 = arith.maximumf %36, %37 : vector<8x128xf32>
      %39 = math.absf %36 : vector<8x128xf32>
      %cst_18 = arith.constant 0.000000e+00 : f32
      %40 = vector.broadcast %cst_18 : f32 to vector<8x128xf32>
      %41 = arith.subf %40, %39 : vector<8x128xf32>
      %42 = math.exp %41 : vector<8x128xf32>
      %cst_19 = arith.constant 1.000000e+00 : f32
      %43 = vector.broadcast %cst_19 : f32 to vector<8x128xf32>
      %44 = arith.addf %43, %42 : vector<8x128xf32>
      %45 = math.log %44 : vector<8x128xf32>
      %46 = arith.addf %38, %45 : vector<8x128xf32>
      %47 = tpu.iota {dimensions = array<i32: 1>} : vector<8x128xi32>
      %c1_i32_20 = arith.constant 1 : i32
      %48 = vector.broadcast %c1_i32_20 : i32 to vector<8x128xi32>
      %49 = arith.andi %47, %48 : vector<8x128xi32>
      %c0_i32_21 = arith.constant 0 : i32
      %50 = vector.broadcast %c0_i32_21 : i32 to vector<8x128xi32>
      %51 = arith.cmpi eq, %49, %50 : vector<8x128xi32>
      %c0_22 = arith.constant 0 : index
      %c0_23 = arith.constant 0 : index
      %c0_24 = arith.constant 0 : index
      %52 = vector.load %arg4[%c0_22, %c0_23, %c0_24] : memref<1x1x128xf32, #tpu.memory_space<vmem>>, vector<1x1x128xf32>
      %cst_25 = arith.constant 0.000000e+00 : f32
      %53 = vector.broadcast %cst_25 : f32 to vector<8x128xf32>
      %54 = arith.select %51, %46, %53 : vector<8x128xi1>, vector<8x128xf32>
      %cst_26 = arith.constant dense<0.000000e+00> : vector<128xf32>
      %55 = vector.multi_reduction <add>, %54, %cst_26 [0] : vector<8x128xf32> to vector<128xf32>
      %56 = vector.shape_cast %55 : vector<128xf32> to vector<1x128xf32>
      %57 = vector.shape_cast %56 : vector<1x128xf32> to vector<1x1x128xf32>
      %58 = arith.addf %52, %57 : vector<1x1x128xf32>
      %c0_27 = arith.constant 0 : index
      %c0_28 = arith.constant 0 : index
      %c0_29 = arith.constant 0 : index
      %59 = vector.load %arg4[%c0_27, %c0_28, %c0_29] : memref<1x1x128xf32, #tpu.memory_space<vmem>>, vector<1x1x128xf32>
      tpu.vector_store %arg4[%c0_27, %c0_28, %c0_29], %58 {strides = array<i32>} : memref<1x1x128xf32, #tpu.memory_space<vmem>>, vector<1x1x128xf32>,
    } else {
    }
    %true_15 = arith.constant true
    %30 = arith.xori %26, %true_15 : i1
    %31 = arith.andi %23, %30 : i1
    %32 = arith.extui %31 : i1 to i32
    %c0_i32_16 = arith.constant 0 : i32
    %33 = arith.cmpi ne, %32, %c0_i32_16 : i32
    scf.if %33 {
      %c0 = arith.constant 0 : index
      %c0_17 = arith.constant 0 : index
      %34 = vector.load %arg3[%c0, %c0_17] : memref<8x128xf32, #tpu.memory_space<vmem>>, vector<8x128xf32>
      %c127_i32 = arith.constant 127 : i32
      %35 = tpu.dynamic_rotate %34 by %c127_i32 dim 1 : vector<8x128xf32>, i32 -> vector<8x128xf32>
      %36 = arith.subf %35, %34 : vector<8x128xf32>
      %cst = arith.constant 0.000000e+00 : f32
      %37 = vector.broadcast %cst : f32 to vector<8x128xf32>
      %38 = arith.maximumf %36, %37 : vector<8x128xf32>
      %39 = math.absf %36 : vector<8x128xf32>
      %cst_18 = arith.constant 0.000000e+00 : f32
      %40 = vector.broadcast %cst_18 : f32 to vector<8x128xf32>
      %41 = arith.subf %40, %39 : vector<8x128xf32>
      %42 = math.exp %41 : vector<8x128xf32>
      %cst_19 = arith.constant 1.000000e+00 : f32
      %43 = vector.broadcast %cst_19 : f32 to vector<8x128xf32>
      %44 = arith.addf %43, %42 : vector<8x128xf32>
      %45 = math.log %44 : vector<8x128xf32>
      %46 = arith.addf %38, %45 : vector<8x128xf32>
      %47 = tpu.iota {dimensions = array<i32: 1>} : vector<8x128xi32>
      %c1_i32_20 = arith.constant 1 : i32
      %48 = vector.broadcast %c1_i32_20 : i32 to vector<8x128xi32>
      %49 = arith.andi %47, %48 : vector<8x128xi32>
      %c0_i32_21 = arith.constant 0 : i32
      %50 = vector.broadcast %c0_i32_21 : i32 to vector<8x128xi32>
      %51 = arith.cmpi eq, %49, %50 : vector<8x128xi32>
      %52 = tpu.iota {dimensions = array<i32: 0>} : vector<8x128xi32>
      %53 = vector.broadcast %24 : i32 to vector<8x128xi32>
      %54 = arith.addi %53, %52 : vector<8x128xi32>
      %c0_i32_22 = arith.constant 0 : i32
      %55 = vector.broadcast %c0_i32_22 : i32 to vector<8x128xi32>
      %56 = arith.cmpi slt, %54, %55 : vector<8x128xi32>
      %c0_i32_23 = arith.constant 0 : i32
      %57 = vector.broadcast %c0_i32_23 : i32 to vector<8x128xi32>
      %58 = arith.cmpi eq, %54, %57 : vector<8x128xi32>
      %c104_i32 = arith.constant 104 : i32
      %59 = vector.broadcast %c104_i32 : i32 to vector<8x128xi32>
      %60 = arith.cmpi slt, %47, %59 : vector<8x128xi32>
      %61 = arith.andi %58, %60 : vector<8x128xi1>
      %62 = arith.ori %56, %61 : vector<8x128xi1>
      %63 = arith.andi %51, %62 : vector<8x128xi1>
      %c0_24 = arith.constant 0 : index
      %c0_25 = arith.constant 0 : index
      %c0_26 = arith.constant 0 : index
      %64 = vector.load %arg4[%c0_24, %c0_25, %c0_26] : memref<1x1x128xf32, #tpu.memory_space<vmem>>, vector<1x1x128xf32>
      %cst_27 = arith.constant 0.000000e+00 : f32
      %65 = vector.broadcast %cst_27 : f32 to vector<8x128xf32>
      %66 = arith.select %63, %46, %65 : vector<8x128xi1>, vector<8x128xf32>
      %cst_28 = arith.constant dense<0.000000e+00> : vector<128xf32>
      %67 = vector.multi_reduction <add>, %66, %cst_28 [0] : vector<8x128xf32> to vector<128xf32>
      %68 = vector.shape_cast %67 : vector<128xf32> to vector<1x128xf32>
      %69 = vector.shape_cast %68 : vector<1x128xf32> to vector<1x1x128xf32>
      %70 = arith.addf %64, %69 : vector<1x1x128xf32>
      %c0_29 = arith.constant 0 : index
      %c0_30 = arith.constant 0 : index
      %c0_31 = arith.constant 0 : index
      %71 = vector.load %arg4[%c0_29, %c0_30, %c0_31] : memref<1x1x128xf32, #tpu.memory_space<vmem>>, vector<1x1x128xf32>
      tpu.vector_store %arg4[%c0_29, %c0_30, %c0_31], %70 {strides = array<i32>} : memref<1x1x128xf32, #tpu.memory_space<vmem>>, vector<1x1x128xf32>,
    } else {
    }
    return
  }
  func.func @transform_0(%arg0: i32, %arg1: i32) -> (i32, i32) {
    %c0_i32 = arith.constant 0 : i32
    %0 = arith.minsi %arg1, %c0_i32 : i32
    %c1_i32 = arith.constant 1 : i32
    %1 = arith.muli %arg0, %c1_i32 : i32
    %2 = arith.addi %1, %0 : i32
    %c0_i32_0 = arith.constant 0 : i32
    %3 = arith.minsi %2, %c0_i32_0 : i32
    %c0_i32_1 = arith.constant 0 : i32
    %c0_i32_2 = arith.constant 0 : i32
    return %3, %c0_i32_1 : i32, i32
  }
  func.func @transform_1(%arg0: i32, %arg1: i32) -> (i32, i32) {
    %c1_i32 = arith.constant 1 : i32
    %0 = arith.subi %arg1, %c1_i32 : i32
    %c0_i32 = arith.constant 0 : i32
    %1 = arith.maxsi %0, %c0_i32 : i32
    %c1_i32_0 = arith.constant 1 : i32
    %2 = arith.muli %arg0, %c1_i32_0 : i32
    %3 = arith.addi %2, %1 : i32
    %c0_i32_1 = arith.constant 0 : i32
    %4 = arith.minsi %3, %c0_i32_1 : i32
    %c0_i32_2 = arith.constant 0 : i32
    %c0_i32_3 = arith.constant 0 : i32
    return %4, %c0_i32_2 : i32, i32
  }
  func.func @transform_2(%arg0: i32, %arg1: i32) -> (i32, i32, i32) {
    %c0_i32 = arith.constant 0 : i32
    %c0_i32_0 = arith.constant 0 : i32
    %c0_i32_1 = arith.constant 0 : i32
    return %arg0, %c0_i32, %c0_i32_0 : i32, i32, i32
  }
}

</mosaic_0001>

<bundles_post_ra>
// kernel: binary_loss.1
= control target key start
LH: loop header
LB: loop body
LE: loop exit
PB: predicated region body
PF: predicated region fallthrough
CT: control target
= control target key end

     0   :  { %s623_s9 = smov 0   ;;  %s625_s10 = smov 0   ;;  %s739_s0 = inlined_call_operand.vmem [shape: f32[1,128], index: 0, kind: input, shape index: {}]   ;;  %s740_s1 = inlined_call_operand.vmem [shape: f32[1,128], index: 1, kind: input, shape index: {}]   ;;  %s741_s2 = inlined_call_operand.vmem [shape: f32[1,1,128], index: 2, kind: output, shape index: {}]  }
   0x1   :  { %s627_s11 = smov 0  }
   0x2 LB: > { %s21_s12 = sadd.s32 1, %s597_s10  ;;  %p515_p0 = scmp.ge.s32.totalorder %s601_s11, 1  ;;  %s601_s11 = sphi %s627_s11, %s12_s11   ;;  %s597_s10 = sphi %s625_s10, %s745_s10   ;;  %s593_s9 = sphi %s623_s9, %s744_s9  }
   0x3   : > { %p22_p1 = scmp.ge.s32.totalorder %s21_s12, 2  ;;  %p186_p2 = scmp.lt.s32.totalorder %s601_s11, 3 }
   0x5   : > { %s747_s12 = smov (%p22_p1, %s21_s12), 0  ;;  %p187_p3 = pnand %p515_p0, %p186_p2 }
   0x6   : > { %p224_p4 = scmp.lt.s32.totalorder (!%p187_p3), %s593_s9, 0  ;;  %p527_p6 = scmp.ne.s32.totalorder (!%p187_p3), %s593_s9, 0 }
   0x7   : > { %190 = sbr.rel (%p187_p3) target bundleno = 763 (0x2fb), region = 28 }
   0xc   : > { %s225_s13 = scalar_select %p224_p4, %s593_s9, 0 }
   0xe   : > { %s749_s13 = smov (!%p224_p4, %s225_s13), 0 }
   0xf   : > { %s519_s14 = sshll.u32 %s749_s13, 3  ;;  %270 = sbr.rel (%p527_p6) target bundleno = 22 (0x16), region = 32 }
  0x10   : > { %p232_p5 = scmp.lt.s32.totalorder %s519_s14, 0 }
  0x12   : > { %s751_s14 = smov (!%p232_p5, %s519_s14), 0 }
  0x13   : > { %s648_s17 = scalar_lea.vmem %s739_s0, %s751_s14 }
  0x14   : > { %v603_v0 = vmov 0.0  }
  0x15   : > { %271 = vst [vmem:[%s741_s2] sm:$0x1] %v603_v0 }
  0x16 PF: > { %p273_p7 = scmp.lt.s32.totalorder %s593_s9, 1  ;;  %s528_s20 = sshll.u32 %s593_s9, 3 }
  0x17   : > { %s658_s21 = sadd.s32 8, %s528_s20 }
  0x18   : > { %p660_p8 = pnand %p273_p7, %p273_p7  ;;  %p279_p9 = scmp.le.s32.totalorder %s658_s21, 0 }
  0x1a   : > { %p276_p10 = pneg %p660_p8 }
  0x1c   : > { %p280_p11 = pnand %p279_p9, %p276_p10 }
  0x1d   : > { %s604_s23 = smov (!%p280_p11), 127  }
  0x1e   : > { %283 = sbr.rel (%p280_p11) target bundleno = 209 (0xd1), region = 36 }
  0x23   : > { %v284_v1 = vld [vmem:[%s648_s17] sm:$0xff]  ;;  %v297_v9 = vlaneseq }
  0x24   : > { %285 = vrot.lane.b32.xlu0 %v284_v1, %s604_s23  ;;  %v301_v22 = vld [vmem:[%s741_s2] sm:$0x1] }
  0x25   : > { %v298_v10 = vand.u32 127, %v297_v9 }
  0x27   : > { %v299_v11 = vand.u32 1, %v298_v10 }
  0x29   : > { %vm300_vm0 = vcmp.eq.s32.totalorder %v299_v11, 0 }
  0x96   : > { %v286_v2 = vpop.permute.xlu0 %285 }
  0x97   : > { %v287_v3 = vsub.f32 %v284_v1, %v286_v2 }
  0x99   : > { %v289_v4 = vand.u32 2147483647, %v287_v3  ;;  %v288_v13 = vmax.f32 %v287_v3, 0.0 }
  0x9b   : > { %v290_v5 = vsub.f32 0.0, %v289_v4 }
  0x9d   : > { %v291_v6 = vmul.f32 1.442695, %v290_v5 }
  0x9f   : > { %563 = vpow2.f32 %v291_v6 }
  0xac   : > { %v564_v7 = vpop.eup %563 }
  0xad   : > { %v293_v8 = vadd.f32 1.0, %v564_v7 }
  0xaf   : > { %565 = vlog2.f32 %v293_v8 }
  0xbc   : > { %v566_v12 = vpop.eup %565 }
  0xbd   : > { %v295_v14 = vmul.f32 0.6931472, %v566_v12 }
  0xbf   : > { %v296_v15 = vadd.f32 %v295_v14, %v288_v13 }
  0xc1   : > { %v302_v16 = vsel %vm300_vm0, %v296_v15, 0.0 }
  0xc2   : > { %v303_v17 = vrot.slane %v302_v16, 4 }
  0xc4   : > { %v304_v18 = vadd.f32 %v303_v17, %v302_v16 }
  0xc6   : > { %v305_v19 = vrot.slane %v304_v18, 2 }
  0xc8   : > { %v306_v20 = vadd.f32 %v305_v19, %v304_v18 }
  0xca   : > { %v307_v21 = vrot.slane %v306_v20, 1 }
  0xcc   : > { %v308_v23 = vadd.f32 %v307_v21, %v306_v20 }
  0xce   : > { %v309_v24 = vadd.f32 %v308_v23, %v301_v22 }
  0xd0   : > { %310 = vst [vmem:[%s741_s2] sm:$0x1] %v309_v24 }
  0xd1 PF: > { %p311_p12 = scmp.gt.s32.totalorder %s658_s21, 0 }
  0xd3   : > { %p312_p13 = pnand %p311_p12, %p276_p10 }
  0xd4   : > { %s605_s28 = smov (!%p312_p13), 127  }
  0xd5   : > { %315 = sbr.rel (%p312_p13) target bundleno = 392 (0x188), region = 40 }
  0xda   : > { %v316_v25 = vld [vmem:[%s648_s17] sm:$0xff]  ;;  %v329_v31 = vlaneseq  ;;  %v335_v35 = vstv %s528_s20 }
  0xdb   : > { %317 = vrot.lane.b32.xlu0 %v316_v25, %s605_s28  ;;  %v343_v49 = vld [vmem:[%s741_s2] sm:$0x1] }
  0xdc   : > { %v334_v34 = vshrl.u32 %v329_v31, 7  ;;  %v330_v36 = vand.u32 127, %v329_v31 }
  0xde   : > { %v336_v37 = vadd.s32 %v335_v35, %v334_v34  ;;  %vm339_vm2 = vcmp.lt.s32.totalorder %v330_v36, 74  ;;  %v331_v38 = vand.u32 1, %v330_v36 }
  0xe0   : > { %vm338_vm1 = vcmp.eq.s32.totalorder %v336_v37, 0  ;;  %vm337_vm3 = vcmp.lt.s32.totalorder %v336_v37, 0  ;;  %vm332_vm5 = vcmp.eq.s32.totalorder %v331_v38, 0 }
  0xe1   : > { %vm340_vm4 = vmand %vm338_vm1, %vm339_vm2 }
  0xe2   : > { %vm341_vm6 = vmor %vm337_vm3, %vm340_vm4 }
  0xe3   : > { %vm342_vm7 = vmand %vm332_vm5, %vm341_vm6 }
 0x14d   : > { %v318_v26 = vpop.permute.xlu0 %317 }
 0x14e   : > { %v319_v27 = vsub.f32 %v316_v25, %v318_v26 }
 0x150   : > { %v321_v28 = vand.u32 2147483647, %v319_v27  ;;  %v320_v40 = vmax.f32 %v319_v27, 0.0 }
 0x152   : > { %v322_v29 = vsub.f32 0.0, %v321_v28 }
 0x154   : > { %v323_v30 = vmul.f32 1.442695, %v322_v29 }
 0x156   : > { %567 = vpow2.f32 %v323_v30 }
 0x163   : > { %v568_v32 = vpop.eup %567 }
 0x164   : > { %v325_v33 = vadd.f32 1.0, %v568_v32 }
 0x166   : > { %569 = vlog2.f32 %v325_v33 }
 0x173   : > { %v570_v39 = vpop.eup %569 }
 0x174   : > { %v327_v41 = vmul.f32 0.6931472, %v570_v39 }
 0x176   : > { %v328_v42 = vadd.f32 %v327_v41, %v320_v40 }
 0x178   : > { %v344_v43 = vsel %vm342_vm7, %v328_v42, 0.0 }
 0x179   : > { %v345_v44 = vrot.slane %v344_v43, 4 }
 0x17b   : > { %v346_v45 = vadd.f32 %v345_v44, %v344_v43 }
 0x17d   : > { %v347_v46 = vrot.slane %v346_v45, 2 }
 0x17f   : > { %v348_v47 = vadd.f32 %v347_v46, %v346_v45 }
 0x181   : > { %v349_v48 = vrot.slane %v348_v47, 1 }
 0x183   : > { %v350_v50 = vadd.f32 %v349_v48, %v348_v47 }
 0x185   : > { %v351_v51 = vadd.f32 %v350_v50, %v343_v49 }
 0x187   : > { %352 = vst [vmem:[%s741_s2] sm:$0x1] %v351_v51 }
 0x188 PF: > { %s529_s5 = sadd.s32 4294967295, %s593_s9  ;;  %p355_p0 = scmp.ge.s32.totalorder %s593_s9, 1 }
 0x189   : > { %p356_p1 = scmp.lt.s32.totalorder %s529_s5, 1  ;;  %s692_s6 = sshll.u32 %s529_s5, 3 }
 0x18a   : > { %s360_s7 = sadd.s32 8, %s692_s6 }
 0x18b   : > { %p695_p2 = pnand %p356_p1, %p355_p0  ;;  %p361_p3 = scmp.le.s32.totalorder %s360_s7, 0 }
 0x18d   : > { %p358_p4 = pneg %p695_p2 }
 0x18f   : > { %p362_p5 = pnand %p361_p3, %p358_p4 }
 0x190   : > { %s606_s14 = smov (!%p362_p5), 127  }
 0x191   : > { %365 = sbr.rel (%p362_p5) target bundleno = 580 (0x244), region = 44 }
 0x196   : > { %v366_v52 = vld [vmem:[%s740_s1] sm:$0xff]  ;;  %v379_v60 = vlaneseq }
 0x197   : > { %367 = vrot.lane.b32.xlu0 %v366_v52, %s606_s14  ;;  %v383_v9 = vld [vmem:[%s741_s2] sm:$0x1] }
 0x198   : > { %v380_v61 = vand.u32 127, %v379_v60 }
 0x19a   : > { %v381_v62 = vand.u32 1, %v380_v61 }
 0x19c   : > { %vm382_vm8 = vcmp.eq.s32.totalorder %v381_v62, 0 }
 0x209   : > { %v368_v53 = vpop.permute.xlu0 %367 }
 0x20a   : > { %v369_v54 = vsub.f32 %v368_v53, %v366_v52 }
 0x20c   : > { %v371_v55 = vand.u32 2147483647, %v369_v54  ;;  %v370_v0 = vmax.f32 %v369_v54, 0.0 }
 0x20e   : > { %v372_v56 = vsub.f32 0.0, %v371_v55 }
 0x210   : > { %v373_v57 = vmul.f32 1.442695, %v372_v56 }
 0x212   : > { %571 = vpow2.f32 %v373_v57 }
 0x21f   : > { %v572_v58 = vpop.eup %571 }
 0x220   : > { %v375_v59 = vadd.f32 1.0, %v572_v58 }
 0x222   : > { %573 = vlog2.f32 %v375_v59 }
 0x22f   : > { %v574_v63 = vpop.eup %573 }
 0x230   : > { %v377_v1 = vmul.f32 0.6931472, %v574_v63 }
 0x232   : > { %v378_v2 = vadd.f32 %v377_v1, %v370_v0 }
 0x234   : > { %v384_v3 = vsel %vm382_vm8, %v378_v2, 0.0 }
 0x235   : > { %v385_v4 = vrot.slane %v384_v3, 4 }
 0x237   : > { %v386_v5 = vadd.f32 %v385_v4, %v384_v3 }
 0x239   : > { %v387_v6 = vrot.slane %v386_v5, 2 }
 0x23b   : > { %v388_v7 = vadd.f32 %v387_v6, %v386_v5 }
 0x23d   : > { %v389_v8 = vrot.slane %v388_v7, 1 }
 0x23f   : > { %v390_v10 = vadd.f32 %v389_v8, %v388_v7 }
 0x241   : > { %v391_v11 = vadd.f32 %v390_v10, %v383_v9 }
 0x243   : > { %392 = vst [vmem:[%s741_s2] sm:$0x1] %v391_v11 }
 0x244 PF: > { %p393_p6 = scmp.gt.s32.totalorder %s360_s7, 0 }
 0x246   : > { %p394_p7 = pnand %p393_p6, %p358_p4 }
 0x247   : > { %s607_s21 = smov (!%p394_p7), 127  }
 0x248   : > { %397 = sbr.rel (%p394_p7) target bundleno = 763 (0x2fb), region = 48 }
 0x24d   : > { %v398_v12 = vld [vmem:[%s740_s1] sm:$0xff]  ;;  %v411_v18 = vlaneseq  ;;  %v417_v22 = vstv %s692_s6 }
 0x24e   : > { %399 = vrot.lane.b32.xlu0 %v398_v12, %s607_s21  ;;  %v425_v36 = vld [vmem:[%s741_s2] sm:$0x1] }
 0x24f   : > { %v416_v21 = vshrl.u32 %v411_v18, 7  ;;  %v412_v23 = vand.u32 127, %v411_v18 }
 0x251   : > { %v418_v24 = vadd.s32 %v417_v22, %v416_v21  ;;  %vm421_vm10 = vcmp.lt.s32.totalorder %v412_v23, 104  ;;  %v413_v25 = vand.u32 1, %v412_v23 }
 0x253   : > { %vm420_vm9 = vcmp.eq.s32.totalorder %v418_v24, 0  ;;  %vm419_vm11 = vcmp.lt.s32.totalorder %v418_v24, 0  ;;  %vm414_vm13 = vcmp.eq.s32.totalorder %v413_v25, 0 }
 0x254   : > { %vm422_vm12 = vmand %vm420_vm9, %vm421_vm10 }
 0x255   : > { %vm423_vm14 = vmor %vm419_vm11, %vm422_vm12 }
 0x256   : > { %vm424_vm15 = vmand %vm414_vm13, %vm423_vm14 }
 0x2c0   : > { %v400_v13 = vpop.permute.xlu0 %399 }
 0x2c1   : > { %v401_v14 = vsub.f32 %v400_v13, %v398_v12 }
 0x2c3   : > { %v403_v15 = vand.u32 2147483647, %v401_v14  ;;  %v402_v27 = vmax.f32 %v401_v14, 0.0 }
 0x2c5   : > { %v404_v16 = vsub.f32 0.0, %v403_v15 }
 0x2c7   : > { %v405_v17 = vmul.f32 1.442695, %v404_v16 }
 0x2c9   : > { %575 = vpow2.f32 %v405_v17 }
 0x2d6   : > { %v576_v19 = vpop.eup %575 }
 0x2d7   : > { %v407_v20 = vadd.f32 1.0, %v576_v19 }
 0x2d9   : > { %577 = vlog2.f32 %v407_v20 }
 0x2e6   : > { %v578_v26 = vpop.eup %577 }
 0x2e7   : > { %v409_v28 = vmul.f32 0.6931472, %v578_v26 }
 0x2e9   : > { %v410_v29 = vadd.f32 %v409_v28, %v402_v27 }
 0x2eb   : > { %v426_v30 = vsel %vm424_vm15, %v410_v29, 0.0 }
 0x2ec   : > { %v427_v31 = vrot.slane %v426_v30, 4 }
 0x2ee   : > { %v428_v32 = vadd.f32 %v427_v31, %v426_v30 }
 0x2f0   : > { %v429_v33 = vrot.slane %v428_v32, 2 }
 0x2f2   : > { %v430_v34 = vadd.f32 %v429_v33, %v428_v32 }
 0x2f4   : > { %v431_v35 = vrot.slane %v430_v34, 1 }
 0x2f6   : > { %v432_v37 = vadd.f32 %v431_v35, %v430_v34 }
 0x2f8   : > { %v433_v38 = vadd.f32 %v432_v37, %v425_v36 }
 0x2fa   : > { %434 = vst [vmem:[%s741_s2] sm:$0x1] %v433_v38 }
 0x2fb PF: > { %s12_s11 = sadd.s32 1, %s601_s11   ;;  %s744_s9 = smov %s597_s10 }
 0x2fc   : > { %p9_p8 = scmp.ge.s32.totalorder %s12_s11, 4   ;;  %s745_s10 = smov %s747_s12 }
 0x2fe   :  { %11 = sbr.rel (!%p9_p8) target bundleno = 2 (0x2), region = 81 }

</bundles_post_ra>
